<compile_context>
chip_gen: v7x
topology: tpu7x:2x2x1
jax: 0.10.0
libtpu: 0.0.40
codegen_flags: <defaults>
</compile_context>

<pallas_src>
import functools

import jax
import jax.numpy as jnp
from jax import lax
from jax.experimental import pallas as pl
from jax.experimental.pallas import tpu as pltpu

_MASK_VAL = -1e30      # Python float: never capture device constants in kernels.


def _round_up(x, m):
    return (x + m - 1) // m * m


# ---------------------------------------------------------------------------
# Stage A: feature-major projection + per-head attention coefficients
#   xp_t[f, n] = (W^T @ x_t)[f, n];  a_src / a_dst head-major [H, n]
# ---------------------------------------------------------------------------
def _proj_kernel(xt_ref, wt_ref, attsrc_ref, attdst_ref,
                 xp_ref, asrc_ref, adst_ref, *, C):
    # MXU matmul, bf16 operands, f32 accumulation.
    xp = jnp.dot(wt_ref[...], xt_ref[...],
                 preferred_element_type=jnp.float32)          # [hc, t_n]
    a_s = xp * attsrc_ref[...]                                # att cols [hc, 1]
    a_d = xp * attdst_ref[...]
    if C == 1:                                                # many heads, 1 ch/head
        asrc_ref[...] = a_s
        adst_ref[...] = a_d
    else:                                                     # single head, C channels
        asrc_ref[...] = jnp.sum(a_s, axis=0, keepdims=True)
        adst_ref[...] = jnp.sum(a_d, axis=0, keepdims=True)
    xp_ref[...] = xp.astype(xp_ref.dtype)


def _project(x_t, Wt, att_src_col, att_dst_col, *, H, C, xp_dtype):
    f_in, n_pad = x_t.shape
    hc = H * C
    t_n = 512 if n_pad % 512 == 0 else (256 if n_pad % 256 == 0 else 128)
    kernel = functools.partial(_proj_kernel, C=C)
    return pl.pallas_call(
        kernel,
        out_shape=(jax.ShapeDtypeStruct((hc, n_pad), xp_dtype),
                   jax.ShapeDtypeStruct((H, n_pad), jnp.float32),
                   jax.ShapeDtypeStruct((H, n_pad), jnp.float32)),
        grid=(n_pad // t_n,),
        in_specs=[
            pl.BlockSpec((f_in, t_n), lambda i: (0, i)),
            pl.BlockSpec((hc, f_in), lambda i: (0, 0)),
            pl.BlockSpec((hc, 1), lambda i: (0, 0)),
            pl.BlockSpec((hc, 1), lambda i: (0, 0)),
        ],
        out_specs=(pl.BlockSpec((hc, t_n), lambda i: (0, i)),
                   pl.BlockSpec((H, t_n), lambda i: (0, i)),
                   pl.BlockSpec((H, t_n), lambda i: (0, i))),
        compiler_params=pltpu.CompilerParams(dimension_semantics=("parallel",)),
    )(x_t, Wt, att_src_col, att_dst_col)


# ---------------------------------------------------------------------------
# In-kernel adjacency helpers (scalar tile-skip + rank-1 element mask)
# ---------------------------------------------------------------------------
def _tile_alive(i, j, t_dst, t_src, n1, n_real, inside):
    """Scalar bool: does this (dst-tile, src-tile) pair contain any allowed edge
    that matters (real dst, real src)?"""
    d_lo = i * t_dst
    d_hi = d_lo + t_dst
    s_lo = j * t_src
    s_hi = s_lo + t_src
    if inside:
        opposite = jnp.logical_or(
            jnp.logical_and(d_hi <= n1, s_lo >= n1),
            jnp.logical_and(s_hi <= n1, d_lo >= n1))
        pair_ok = jnp.logical_not(opposite)
    else:
        same1 = jnp.logical_and(d_hi <= n1, s_hi <= n1)
        same2 = jnp.logical_and(d_lo >= n1, s_lo >= n1)
        diag = jnp.logical_and(d_lo < s_hi, s_lo < d_hi)      # self-loop overlap
        pair_ok = jnp.logical_or(
            jnp.logical_not(jnp.logical_or(same1, same2)), diag)
    return jnp.logical_and(pair_ok,
                           jnp.logical_and(s_lo < n_real, d_lo < n_real))


def _allowed_mask(i, j, t_dst, t_src, n1, n_real, inside):
    """[t_src, t_dst] bool mask, built from rank-1 iota pieces."""
    d_ids = i * t_dst + lax.broadcasted_iota(jnp.int32, (1, t_dst), 1)
    s_ids = j * t_src + lax.broadcasted_iota(jnp.int32, (t_src, 1), 0)
    d_in1 = d_ids < n1
    s_in1 = s_ids < n1
    if inside:
        allowed = d_in1 == s_in1                               # same set (incl. self)
    else:
        allowed = jnp.logical_or(d_in1 != s_in1, d_ids == s_ids)  # cross + self-loops
    return jnp.logical_and(allowed, s_ids < n_real)            # drop padded sources


# ---------------------------------------------------------------------------
# Stage B, conv1 flavour: many heads, out_ch per head == 1, concat + ELU
#   layout: dst on lanes, src on sublanes; per-dst state lane-dense.
# ---------------------------------------------------------------------------
def _attn_c1_kernel(scalars_ref, adst_ref, asrc_ref, xp_ref, bias_ref,
                    out_ref, m_sc, l_sc, acc_sc,
                    *, t_dst, t_src, inside, apply_elu):
    i = pl.program_id(1)
    j = pl.program_id(2)

    @pl.when(j == 0)
    def _init():
        m_sc[...] = jnp.full_like(m_sc, _MASK_VAL)
        l_sc[...] = jnp.zeros_like(l_sc)
        acc_sc[...] = jnp.zeros_like(acc_sc)

    n1 = scalars_ref[0]
    n_real = scalars_ref[1]
    alive = _tile_alive(i, j, t_dst, t_src, n1, n_real, inside)

    @pl.when(alive)
    def _compute():
        # edge logits: [hb,1,Td] + [hb,Ts,1] -> [hb,Ts,Td]  (dst lane-dense)
        s = adst_ref[...] + asrc_ref[...]
        s = jnp.where(s > 0, s, 0.2 * s)                       # leaky_relu(0.2)
        allowed = _allowed_mask(i, j, t_dst, t_src, n1, n_real, inside)
        s = jnp.where(allowed, s, _MASK_VAL)

        # online softmax over the source (sublane) axis.
        m_prev = m_sc[...]                                     # [hb,1,Td]
        m_new = jnp.maximum(m_prev, jnp.max(s, axis=1, keepdims=True))
        alpha = jnp.exp(m_prev - m_new)
        p = jnp.exp(s - m_new)                                 # [hb,Ts,Td]
        l_sc[...] = alpha * l_sc[...] + jnp.sum(p, axis=1, keepdims=True)
        # out_ch == 1: weighted sum of per-head scalar features (VPU + sublane reduce)
        acc_sc[...] = alpha * acc_sc[...] + jnp.sum(p * xp_ref[...], axis=1,
                                                    keepdims=True)
        m_sc[...] = m_new

    @pl.when(j == pl.num_programs(2) - 1)
    def _finalize():
        l = l_sc[...]
        inv = pl.reciprocal(jnp.where(l > 0, l, 1.0), approx=True)
        out = acc_sc[...] * inv + bias_ref[...]
        if apply_elu:
            out = jnp.where(out > 0, out, jnp.exp(jnp.minimum(out, 0.0)) - 1.0)
        out_ref[...] = out.astype(out_ref.dtype)


def _attend_c1(scalars, a_dst, a_src, xp, bias, *, H, inside, apply_elu,
               t_dst, t_src, n_pad):
    hb = 8 if H % 8 == 0 else H
    a_dst3 = a_dst.reshape(H, 1, n_pad)          # dst on lanes (lane-dense)
    a_src3 = a_src.reshape(H, n_pad, 1)          # src on sublanes
    xp3 = xp.reshape(H, n_pad, 1)                # src on sublanes
    bias3 = bias.reshape(H, 1, 1).astype(jnp.float32)

    kernel = functools.partial(_attn_c1_kernel, t_dst=t_dst, t_src=t_src,
                               inside=inside, apply_elu=apply_elu)
    grid = (H // hb, n_pad // t_dst, n_pad // t_src)
    out3 = pl.pallas_call(
        kernel,
        out_shape=jax.ShapeDtypeStruct((H, 1, n_pad), jnp.float32),
        grid_spec=pltpu.PrefetchScalarGridSpec(
            num_scalar_prefetch=1,
            grid=grid,
            in_specs=[
                pl.BlockSpec((hb, 1, t_dst), lambda h, i, j, s: (h, 0, i)),
                pl.BlockSpec((hb, t_src, 1), lambda h, i, j, s: (h, j, 0)),
                pl.BlockSpec((hb, t_src, 1), lambda h, i, j, s: (h, j, 0)),
                pl.BlockSpec((hb, 1, 1), lambda h, i, j, s: (h, 0, 0)),
            ],
            out_specs=pl.BlockSpec((hb, 1, t_dst), lambda h, i, j, s: (h, 0, i)),
            scratch_shapes=[pltpu.VMEM((hb, 1, t_dst), jnp.float32)] * 3,
        ),
        compiler_params=pltpu.CompilerParams(
            dimension_semantics=("parallel", "parallel", "arbitrary")),
    )(scalars, a_dst3, a_src3, xp3, bias3)
    return out3.reshape(H, n_pad)                # head-major (= concat), feature-major


# ---------------------------------------------------------------------------
# Stage B, conv2 flavour: single head, many channels (head-mean == identity)
#   feature-major output [C, n_pad]; aggregation on the MXU.
# ---------------------------------------------------------------------------
def _attn_c2_kernel(scalars_ref, adst_ref, asrc_ref, xpt_ref, bias_ref,
                    out_ref, m_sc, l_sc, acc_sc,
                    *, t_dst, t_src, inside, apply_elu):
    i = pl.program_id(0)
    j = pl.program_id(1)

    @pl.when(j == 0)
    def _init():
        m_sc[...] = jnp.full_like(m_sc, _MASK_VAL)
        l_sc[...] = jnp.zeros_like(l_sc)
        acc_sc[...] = jnp.zeros_like(acc_sc)

    n1 = scalars_ref[0]
    n_real = scalars_ref[1]
    alive = _tile_alive(i, j, t_dst, t_src, n1, n_real, inside)

    @pl.when(alive)
    def _compute():
        s = adst_ref[...] + asrc_ref[...]                      # [1,Td]+[Ts,1]->[Ts,Td]
        s = jnp.where(s > 0, s, 0.2 * s)
        allowed = _allowed_mask(i, j, t_dst, t_src, n1, n_real, inside)
        s = jnp.where(allowed, s, _MASK_VAL)

        m_prev = m_sc[...]                                     # [1,Td]
        m_new = jnp.maximum(m_prev, jnp.max(s, axis=0, keepdims=True))
        alpha = jnp.exp(m_prev - m_new)
        p = jnp.exp(s - m_new)                                 # [Ts,Td]
        l_sc[...] = alpha * l_sc[...] + jnp.sum(p, axis=0, keepdims=True)
        # aggregate on the MXU: [C,Ts] x [Ts,Td] -> [C,Td], bf16 ops / f32 acc.
        acc_sc[...] = alpha * acc_sc[...] + jnp.dot(
            xpt_ref[...], p.astype(jnp.bfloat16),
            preferred_element_type=jnp.float32)
        m_sc[...] = m_new

    @pl.when(j == pl.num_programs(1) - 1)
    def _finalize():
        l = l_sc[...]
        inv = pl.reciprocal(jnp.where(l > 0, l, 1.0), approx=True)
        out = acc_sc[...] * inv + bias_ref[...]
        if apply_elu:
            out = jnp.where(out > 0, out, jnp.exp(jnp.minimum(out, 0.0)) - 1.0)
        out_ref[...] = out.astype(out_ref.dtype)


def _attend_c2(scalars, a_dst, a_src, xp_t, bias, *, C, inside, apply_elu,
               t_dst, t_src, n_pad):
    a_dst_row = a_dst.reshape(1, n_pad)
    a_src_col = a_src.reshape(n_pad, 1)
    bias_col = bias.reshape(C, 1).astype(jnp.float32)

    kernel = functools.partial(_attn_c2_kernel, t_dst=t_dst, t_src=t_src,
                               inside=inside, apply_elu=apply_elu)
    grid = (n_pad // t_dst, n_pad // t_src)
    return pl.pallas_call(
        kernel,
        out_shape=jax.ShapeDtypeStruct((C, n_pad), jnp.float32),
        grid_spec=pltpu.PrefetchScalarGridSpec(
            num_scalar_prefetch=1,
            grid=grid,
            in_specs=[
                pl.BlockSpec((1, t_dst), lambda i, j, s: (0, i)),
                pl.BlockSpec((t_src, 1), lambda i, j, s: (j, 0)),
                pl.BlockSpec((C, t_src), lambda i, j, s: (0, j)),
                pl.BlockSpec((C, 1), lambda i, j, s: (0, 0)),
            ],
            out_specs=pl.BlockSpec((C, t_dst), lambda i, j, s: (0, i)),
            scratch_shapes=[pltpu.VMEM((1, t_dst), jnp.float32),
                            pltpu.VMEM((1, t_dst), jnp.float32),
                            pltpu.VMEM((C, t_dst), jnp.float32)],
        ),
        compiler_params=pltpu.CompilerParams(
            dimension_semantics=("parallel", "arbitrary")),
    )(scalars, a_dst_row, a_src_col, xp_t, bias_col)


# ---------------------------------------------------------------------------
# One GATConv layer (feature-major in / feature-major out)
# ---------------------------------------------------------------------------
def gat_conv(x_t, scalars, *, W, att_src, att_dst, bias, heads, out_ch,
             apply_elu, inside):
    H, C = heads, out_ch
    hc = H * C
    # This module only exercises (C==1, concat) and (H==1, head-mean==identity).
    assert C == 1 or H == 1   # TODO(synk): general (H>1, C>1) head-block path
    _, n_pad = x_t.shape

    Wt = jnp.asarray(W, jnp.float32).T.astype(jnp.bfloat16)     # [hc, f_in]
    att_s_col = jnp.asarray(att_src, jnp.float32).reshape(hc, 1)
    att_d_col = jnp.asarray(att_dst, jnp.float32).reshape(hc, 1)

    xp_dtype = jnp.float32 if C == 1 else jnp.bfloat16
    xp_t, a_src, a_dst = _project(x_t.astype(jnp.bfloat16), Wt,
                                  att_s_col, att_d_col, H=H, C=C,
                                  xp_dtype=xp_dtype)

    t_dst, t_src = 128, 128
    if C == 1:
        return _attend_c1(scalars, a_dst, a_src, xp_t,
                          jnp.asarray(bias, jnp.float32), H=H,
                          inside=inside, apply_elu=apply_elu,
                          t_dst=t_dst, t_src=t_src, n_pad=n_pad)
    return _attend_c2(scalars, a_dst, a_src, xp_t,
                      jnp.asarray(bias, jnp.float32), C=C,
                      inside=inside, apply_elu=apply_elu,
                      t_dst=t_dst, t_src=t_src, n_pad=n_pad)


# ---------------------------------------------------------------------------
# Full GAT forward (equivalent of GAT.forward up to the sinkhorn matcher)
# ---------------------------------------------------------------------------
def gat_forward(desc1, desc2, params):
    n1, n2 = desc1.shape[0], desc2.shape[0]
    n = n1 + n2
    x = jnp.concatenate([desc1, desc2], axis=0).astype(jnp.float32)

    n_pad = max(128, _round_up(n, 128))
    x_t = jnp.pad(x, ((0, n_pad - n), (0, 0))).T      # feature-major [F, n_pad]
    scalars = jnp.array([n1, n], jnp.int32)           # scalar-prefetched (SMEM)

    conv1 = functools.partial(
        gat_conv, W=params["W1"], att_src=params["as1"], att_dst=params["ad1"],
        bias=params["b1"], heads=params["H1"], out_ch=params["C1"],
        apply_elu=True)                               # F.elu fused into the kernel
    conv2 = functools.partial(
        gat_conv, W=params["W2"], att_src=params["as2"], att_dst=params["ad2"],
        bias=params["b2"], heads=params["H2"], out_ch=params["C2"],
        apply_elu=False)

    # TODO(synk): for tiny N, fuse projection+attention per layer to cut launches.
    h_t = x_t
    for _ in range(2):                                # iters = 2
        h_t = conv1(h_t, scalars, inside=True)        # conv1 on inside edges + ELU
        h_t = conv1(h_t, scalars, inside=False)       # conv1 on cross edges + ELU
    out_t = conv2(h_t, scalars, inside=False)         # final conv2 on cross edges

    out = out_t.T[:n]
    # TODO(synk): sinkhorn_match is not defined in the source module; return embeddings.
    return out[:n1], out[n1:]


# ---------------------------------------------------------------------------
# Pure-JAX dense reference (for a loose correctness check at demo size)
# ---------------------------------------------------------------------------
def _ref_gat_forward(desc1, desc2, params):
    n1 = desc1.shape[0]
    n = n1 + desc2.shape[0]
    x = jnp.concatenate([desc1, desc2], axis=0).astype(jnp.float32)
    ids = jnp.arange(n)
    side = ids < n1
    eye = ids[:, None] == ids[None, :]
    adj_in = side[:, None] == side[None, :]                   # same-set (incl. self)
    adj_cr = jnp.logical_or(side[:, None] != side[None, :], eye)

    def conv(h, adj, W, a_s, a_d, b, H, C, elu):
        xp = (h @ W).reshape(n, H, C)
        s_src = jnp.einsum('nhc,hc->nh', xp, jnp.asarray(a_s).reshape(H, C))
        s_dst = jnp.einsum('nhc,hc->nh', xp, jnp.asarray(a_d).reshape(H, C))
        e = s_dst[:, None, :] + s_src[None, :, :]
        e = jnp.where(e > 0, e, 0.2 * e)
        e = jnp.where(adj[:, :, None], e, -jnp.inf)
        attn = jax.nn.softmax(e, axis=1)
        out = jnp.einsum('ijh,jhc->ihc', attn, xp).reshape(n, H * C) + b
        if elu:
            out = jnp.where(out > 0, out, jnp.exp(jnp.minimum(out, 0.0)) - 1.0)
        return out

    h = x
    for _ in range(2):
        h = conv(h, adj_in, params["W1"], params["as1"], params["ad1"],
                 params["b1"], params["H1"], params["C1"], True)
        h = conv(h, adj_cr, params["W1"], params["as1"], params["ad1"],
                 params["b1"], params["H1"], params["C1"], True)
    out = conv(h, adj_cr, params["W2"], params["as2"], params["ad2"],
               params["b2"], params["H2"], params["C2"], False)
    return out[:n1], out[n1:]


if __name__ == "__main__":
    # Small shapes consistent with the module (in=out=hidden*heads, hid=1).
    IN_CH = 32      # stands in for in_channels=128
    HID = 1         # self.hid
    IN_HEAD = 32    # stands in for self.in_head=128 (so HID*IN_HEAD == IN_CH)
    OUT_CH = 32     # stands in for out_channels=128
    OUT_HEAD = 1    # self.out_head
    n1 = n2 = 8     # descriptors per image

    key = jax.random.PRNGKey(0)
    ks = jax.random.split(key, 10)
    desc1 = jax.random.normal(ks[0], (n1, IN_CH), jnp.float32)
    desc2 = jax.random.normal(ks[1], (n2, IN_CH), jnp.float32)

    params = {
        # conv1: GATConv(IN_CH, HID, heads=IN_HEAD, concat=True)
        "W1":  0.1 * jax.random.normal(ks[2], (IN_CH, IN_HEAD * HID), jnp.float32),
        "as1": 0.1 * jax.random.normal(ks[3], (IN_HEAD, HID), jnp.float32),
        "ad1": 0.1 * jax.random.normal(ks[4], (IN_HEAD, HID), jnp.float32),
        "b1":  jnp.zeros((IN_HEAD * HID,), jnp.float32),
        "H1": IN_HEAD, "C1": HID,
        # conv2: GATConv(HID*IN_HEAD, OUT_CH, heads=OUT_HEAD, concat=False)
        "W2":  0.1 * jax.random.normal(ks[5], (IN_HEAD * HID, OUT_HEAD * OUT_CH), jnp.float32),
        "as2": 0.1 * jax.random.normal(ks[6], (OUT_HEAD, OUT_CH), jnp.float32),
        "ad2": 0.1 * jax.random.normal(ks[7], (OUT_HEAD, OUT_CH), jnp.float32),
        "b2":  jnp.zeros((OUT_CH,), jnp.float32),
        "H2": OUT_HEAD, "C2": OUT_CH,
    }

    d1, d2 = gat_forward(desc1, desc2, params)
    jax.block_until_ready((d1, d2))
    assert d1.shape == (n1, OUT_CH) and d2.shape == (n2, OUT_CH)
    assert bool(jnp.all(jnp.isfinite(d1))) and bool(jnp.all(jnp.isfinite(d2)))

    # Loose tolerance check against the dense pure-JAX reference
    # (bf16 MXU operands + approx reciprocal in the kernels).
    r1, r2 = _ref_gat_forward(desc1, desc2, params)
    ref = jnp.concatenate([r1, r2], axis=0)
    got = jnp.concatenate([d1, d2], axis=0)
    scale = float(jnp.max(jnp.abs(ref)))
    err = float(jnp.max(jnp.abs(got - ref)))
    assert err <= 5e-3 + 0.1 * scale, f"mismatch vs reference: err={err}, scale={scale}"

    print("KERNEL_OK")
</pallas_src>

<mosaic_0001>
module attributes {stable_mosaic.version = 11 : i64} {
  func.func @_proj_kernel(%arg0: i32, %arg1: memref<32x128xbf16, #tpu.memory_space<vmem>>, %arg2: memref<32x32xbf16, #tpu.memory_space<vmem>>, %arg3: memref<32x1xf32, #tpu.memory_space<vmem>>, %arg4: memref<32x1xf32, #tpu.memory_space<vmem>>, %arg5: memref<32x128xf32, #tpu.memory_space<vmem>>, %arg6: memref<32x128xf32, #tpu.memory_space<vmem>>, %arg7: memref<32x128xf32, #tpu.memory_space<vmem>>) attributes {dimension_semantics = [#tpu.dimension_semantics<parallel>], iteration_bounds = array<i64: 1>, scalar_prefetch = 0 : i64, scratch_operands = 0 : i64, tpu.core_type = #tpu.core_type<tc>, window_params = [{transform_indices = @transform_0, window_bounds = array<i64: 32, 128>}, {pipeline_mode = #tpu.pipeline_mode<synchronous>, transform_indices = @transform_1, window_bounds = array<i64: 32, 32>}, {pipeline_mode = #tpu.pipeline_mode<synchronous>, transform_indices = @transform_2, window_bounds = array<i64: 32, 1>}, {pipeline_mode = #tpu.pipeline_mode<synchronous>, transform_indices = @transform_3, window_bounds = array<i64: 32, 1>}, {transform_indices = @transform_4, window_bounds = array<i64: 32, 128>}, {transform_indices = @transform_5, window_bounds = array<i64: 32, 128>}, {transform_indices = @transform_6, window_bounds = array<i64: 32, 128>}]} {
    %c0 = arith.constant 0 : index
    %c0_0 = arith.constant 0 : index
    %0 = vector.load %arg2[%c0, %c0_0] : memref<32x32xbf16, #tpu.memory_space<vmem>>, vector<32x32xbf16>
    %c0_1 = arith.constant 0 : index
    %c0_2 = arith.constant 0 : index
    %1 = vector.load %arg1[%c0_1, %c0_2] : memref<32x128xbf16, #tpu.memory_space<vmem>>, vector<32x128xbf16>
    %cst = arith.constant dense<0.000000e+00> : vector<32x128xf32>
    %2 = tpu.matmul %0, %1, %cst {dimension_numbers = #tpu.dot_dimension_numbers<[1], [0], [0], [1], [0, 0, 1, 1], [], []>} : vector<32x32xbf16>, vector<32x128xbf16>, vector<32x128xf32> -> vector<32x128xf32>
    %c0_3 = arith.constant 0 : index
    %c0_4 = arith.constant 0 : index
    %3 = vector.load %arg3[%c0_3, %c0_4] : memref<32x1xf32, #tpu.memory_space<vmem>>, vector<32x1xf32>
    %4 = vector.broadcast %3 : vector<32x1xf32> to vector<32x128xf32>
    %5 = arith.mulf %2, %4 : vector<32x128xf32>
    %c0_5 = arith.constant 0 : index
    %c0_6 = arith.constant 0 : index
    %6 = vector.load %arg4[%c0_5, %c0_6] : memref<32x1xf32, #tpu.memory_space<vmem>>, vector<32x1xf32>
    %7 = vector.broadcast %6 : vector<32x1xf32> to vector<32x128xf32>
    %8 = arith.mulf %2, %7 : vector<32x128xf32>
    %c0_7 = arith.constant 0 : index
    %c0_8 = arith.constant 0 : index
    %9 = vector.load %arg6[%c0_7, %c0_8] : memref<32x128xf32, #tpu.memory_space<vmem>>, vector<32x128xf32>
    tpu.vector_store %arg6[%c0_7, %c0_8], %5 {strides = array<i32>} : memref<32x128xf32, #tpu.memory_space<vmem>>, vector<32x128xf32>,
    %c0_9 = arith.constant 0 : index
    %c0_10 = arith.constant 0 : index
    %10 = vector.load %arg7[%c0_9, %c0_10] : memref<32x128xf32, #tpu.memory_space<vmem>>, vector<32x128xf32>
    tpu.vector_store %arg7[%c0_9, %c0_10], %8 {strides = array<i32>} : memref<32x128xf32, #tpu.memory_space<vmem>>, vector<32x128xf32>,
    %c0_11 = arith.constant 0 : index
    %c0_12 = arith.constant 0 : index
    %11 = vector.load %arg5[%c0_11, %c0_12] : memref<32x128xf32, #tpu.memory_space<vmem>>, vector<32x128xf32>
    tpu.vector_store %arg5[%c0_11, %c0_12], %2 {strides = array<i32>} : memref<32x128xf32, #tpu.memory_space<vmem>>, vector<32x128xf32>,
    return
  }
  func.func @transform_0(%arg0: i32) -> (i32, i32) {
    %c0_i32 = arith.constant 0 : i32
    %c0_i32_0 = arith.constant 0 : i32
    return %c0_i32, %arg0 : i32, i32
  }
  func.func @transform_1(%arg0: i32) -> (i32, i32) {
    %c0_i32 = arith.constant 0 : i32
    %c0_i32_0 = arith.constant 0 : i32
    %c0_i32_1 = arith.constant 0 : i32
    return %c0_i32, %c0_i32_0 : i32, i32
  }
  func.func @transform_2(%arg0: i32) -> (i32, i32) {
    %c0_i32 = arith.constant 0 : i32
    %c0_i32_0 = arith.constant 0 : i32
    %c0_i32_1 = arith.constant 0 : i32
    return %c0_i32, %c0_i32_0 : i32, i32
  }
  func.func @transform_3(%arg0: i32) -> (i32, i32) {
    %c0_i32 = arith.constant 0 : i32
    %c0_i32_0 = arith.constant 0 : i32
    %c0_i32_1 = arith.constant 0 : i32
    return %c0_i32, %c0_i32_0 : i32, i32
  }
  func.func @transform_4(%arg0: i32) -> (i32, i32) {
    %c0_i32 = arith.constant 0 : i32
    %c0_i32_0 = arith.constant 0 : i32
    return %c0_i32, %arg0 : i32, i32
  }
  func.func @transform_5(%arg0: i32) -> (i32, i32) {
    %c0_i32 = arith.constant 0 : i32
    %c0_i32_0 = arith.constant 0 : i32
    return %c0_i32, %arg0 : i32, i32
  }
  func.func @transform_6(%arg0: i32) -> (i32, i32) {
    %c0_i32 = arith.constant 0 : i32
    %c0_i32_0 = arith.constant 0 : i32
    return %c0_i32, %arg0 : i32, i32
  }
}

</mosaic_0001>

<bundles_post_ra>
// kernel: tpu_custom_call.1
= control target key start
LH: loop header
LB: loop body
LE: loop exit
PB: predicated region body
PF: predicated region fallthrough
CT: control target
= control target key end

     0   :  { %12 = vsyncpa [#allocation3], 0  ;;  %vm53_vm0 = vcmask 261120   ;;  %v324_v3 = vmov 0   ;;  %s469_s0 = inlined_call_operand.vmem [shape: bf16[32,128], index: 0, kind: input, shape index: {}]   ;;  %s470_s1 = inlined_call_operand.vmem [shape: bf16[32,32], index: 1, kind: input, shape index: {}]   ;;  %s471_s2 = inlined_call_operand.vmem [shape: f32[32,1], index: 2, kind: input, shape index: {}]   ;;  %s472_s3 = inlined_call_operand.vmem [shape: f32[32,1], index: 3, kind: input, shape index: {}]   ;;  %s473_s4 = inlined_call_operand.hbm [shape: f32[32,128], index: 4, kind: output, shape index: {0}]   ;;  %s474_s5 = inlined_call_operand.hbm [shape: f32[32,128], index: 5, kind: output, shape index: {1}]   ;;  %s475_s6 = inlined_call_operand.hbm [shape: f32[32,128], index: 6, kind: output, shape index: {2}]  }
   0x1   :  { %v250_v0 = vld [vmem:[%s469_s0] sm:$0xff]   ;;  %v251_v1 = vld [vmem:[%s469_s0 + $0x8] sm:$0xff]   ;;  %249 = vset.pattern.permute.xlu1 %v324_v3  ;;  %248 = vset.pattern.permute.xlu0 %v324_v3  ;;  %v111_v4 = vld [vmem:[%s471_s2 + $0x10] sm:$0xff] }
   0x2   :  { %234 = vmatprep.subr.bf16.mxu0 %v250_v0  ;;  %v252_v2 = vld [vmem:[%s470_s1] sm:$0xff]   ;;  %v253_v6 = vld [vmem:[%s470_s1 + $0x8] sm:$0xff]   ;;  %125 = vperm.xlu1 %249, %v111_v4   ;;  %v112_v7 = vld [vmem:[%s471_s2 + $0x18] sm:$0xff] }
   0x3   :  { %235 = vmatpush3.bf16.msra.mxu0 %v250_v0  ;;  %238 = vmatprep.mubr.msk.bf16.mxu0 %vm53_vm0, %v252_v2  ;;  %v109_v5 = vld [vmem:[%s471_s2] sm:$0xff]  ;;  %v110_v8 = vld [vmem:[%s471_s2 + $0x8] sm:$0xff] }
   0x4   :  { %236 = vmatprep.subr.bf16.mxu0 %v251_v1  ;;  %115 = vperm.xlu0 %248, %v109_v5  }
   0x5   :  { %13 = vsyncpa [#allocation5], 0  ;;  %v138_v9 = vld [vmem:[%s472_s3 + $0x8] sm:$0xff]  ;;  %v137_v10 = vld [vmem:[%s472_s3] sm:$0xff]  ;;  %s325_s18 = smov [#allocation2]   ;;  %s326_s20 = smov [#allocation4]  }
   0x6   :  { %130 = vperm.xlu1 %249, %v112_v7   ;;  %v140_v11 = vld [vmem:[%s472_s3 + $0x18] sm:$0xff]  ;;  %v139_v12 = vld [vmem:[%s472_s3 + $0x10] sm:$0xff]  ;;  %s182_s19 = sshll.u32 %s325_s18, 4  ;;  %s194_s21 = sshll.u32 %s326_s20, 4  ;;  %s403_s19 = int_to_ptr.vmem [resolvable:$true] %s182_s19  ;;  %s405_s21 = int_to_ptr.vmem [resolvable:$true] %s194_s21 }
   0x7   :  { %237 = vmatpush3.bf16.msra.mxu0 %v251_v1  ;;  %s327_s22 = smov [#allocation6]   ;;  %s254_s23 = scalar_lea.vmem %s403_s19, 512 }
   0x8   :  { %120 = vperm.xlu0 %248, %v110_v8   ;;  %s206_s3 = sshll.u32 %s327_s22, 4  ;;  %p255_p0 = scmp.ne.s32.totalorder %s403_s19, %s254_s23  ;;  %s407_s3 = int_to_ptr.vmem [resolvable:$true] %s206_s3 }
   0x9   :  { %p259_p1 = scmp.lt.s32.totalorder %s403_s19, %s403_s19  ;;  %p260_p2 = scmp.lt.s32.totalorder %s254_s23, %s254_s23 }
   0xa   :  { %239 = vmatmul.mubr.msk.bf16.vlgmr.msra.gmra.mrb[0].mxu0 %vm53_vm0, %v253_v6  ;;  %148 = vperm.xlu1 %249, %v138_v9  }
   0xb   :  { %p261_p3 = por %p260_p2, %p259_p1 }
   0xc   :  { %143 = vperm.xlu0 %248, %v137_v10  }
   0xd   :  { %p262_p4 = pnand %p261_p3, %p255_p0 }
   0xe   :  { %158 = vperm.xlu1 %249, %v140_v11  }
  0x10   :  { %153 = vperm.xlu0 %248, %v139_v12  }
  0x81   :  { %v126_v14 = vpop.permute.xlu1 %125 }
  0x83   :  { %v116_v13 = vpop.permute.xlu0 %115 }
  0x85   :  { %v131_v16 = vpop.permute.xlu1 %130 }
  0x87   :  { %v121_v15 = vpop.permute.xlu0 %120 }
  0x89   :  { %v149_v18 = vpop.permute.xlu1 %148 }
  0x8b   :  { %v144_v17 = vpop.permute.xlu0 %143 }
  0x8d   :  { %v159_v24 = vpop.permute.xlu1 %158 }
  0x8f   :  { %v154_v19 = vpop.permute.xlu0 %153 }
  0xdd   :  { %v240_v20 = vpop.f32.mrb[0].mxu0 }
  0xde   :  { %v135_v21 = vmul.f32 %v240_v20, %v126_v14  ;;  %v163_v22 = vmul.f32 %v240_v20, %v154_v19  ;;  %175 = vst [vmem:[#allocation2 + $0x10] sm:$0xff] %v240_v20  ;;  %v94_v23 = vpop.f32.mrb[1].mxu0 }
  0xdf   :  { %v133_v25 = vmul.f32 %v116_v13, %v94_v23  ;;  %v161_v26 = vmul.f32 %v144_v17, %v94_v23  ;;  %173 = vst [vmem:[#allocation2] sm:$0xff] %v94_v23  ;;  %v241_v27 = vpop.f32.mrb[2].mxu0 }
  0xe0   :  { %167 = vst [vmem:[#allocation4 + $0x10] sm:$0xff] %v135_v21  ;;  %171 = vst [vmem:[#allocation6 + $0x10] sm:$0xff] %v163_v22  ;;  %v136_v28 = vmul.f32 %v241_v27, %v131_v16  ;;  %v164_v29 = vmul.f32 %v241_v27, %v159_v24  ;;  %v97_v30 = vpop.f32.mrb[3].mxu0 }
  0xe1   :  { %176 = vst [vmem:[#allocation2 + $0x18] sm:$0xff] %v241_v27  ;;  %165 = vst [vmem:[#allocation4] sm:$0xff] %v133_v25  ;;  %v134_v31 = vmul.f32 %v121_v15, %v97_v30  ;;  %v162_v32 = vmul.f32 %v149_v18, %v97_v30 }
  0xe2   :  { %169 = vst [vmem:[#allocation6] sm:$0xff] %v161_v26  ;;  %174 = vst [vmem:[#allocation2 + $0x8] sm:$0xff] %v97_v30 }
  0xe3   :  { %168 = vst [vmem:[#allocation4 + $0x18] sm:$0xff] %v136_v28  ;;  %172 = vst [vmem:[#allocation6 + $0x18] sm:$0xff] %v164_v29 }
  0xe4   :  { %265 = shalt.err (!%p262_p4)
}
  0xe5   :  { %s266_s26 = scalar_lea.hbm %s473_s4, 512 }
  0xe6   :  { %p267_p5 = scmp.ne.s32.totalorder %s473_s4, %s266_s26  ;;  %p270_p6 = scmp.lt.u32.totalorder %s266_s26, %s473_s4 }
  0xe8   :  { %p272_p7 = pnand %p270_p6, %p267_p5 }
  0xea   :  { %275 = shalt.err (!%p272_p7)
}
  0xeb   :  { %s328_s0 = smov 128   ;;  %s329_s7 = smov 8   ;;  %166 = vst [vmem:[#allocation4 + $0x8] sm:$0xff] %v134_v31  ;;  %170 = vst [vmem:[#allocation6 + $0x8] sm:$0xff] %v162_v32 }
  0xec   :  { %188 = dma.vmem_to_hbm [thread:$0]  %s403_s19, 512, %s473_s4, [#allocation3], %s328_s0, %s328_s0, %s329_s7  }
  0xed   :  { %s276_s10 = scalar_lea.vmem %s405_s21, 512  ;;  %p281_p9 = scmp.lt.s32.totalorder %s405_s21, %s405_s21 }
  0xee   :  { %p277_p8 = scmp.ne.s32.totalorder %s405_s21, %s276_s10  ;;  %p282_p10 = scmp.lt.s32.totalorder %s276_s10, %s276_s10 }
  0xf0   :  { %p283_p11 = por %p282_p10, %p281_p9 }
  0xf2   :  { %p284_p12 = pnand %p283_p11, %p277_p8 }
  0xf4   :  { %287 = shalt.err (!%p284_p12)
}
  0xf5   :  { %s288_s13 = scalar_lea.hbm %s474_s5, 512 }
  0xf6   :  { %p289_p13 = scmp.ne.s32.totalorder %s474_s5, %s288_s13  ;;  %p292_p0 = scmp.lt.u32.totalorder %s288_s13, %s474_s5 }
  0xf8   :  { %p294_p1 = pnand %p292_p0, %p289_p13 }
  0xfa   :  { %297 = shalt.err (!%p294_p1)
}
  0xfb   :  { %200 = dma.vmem_to_hbm [thread:$0]  %s405_s21, 512, %s474_s5, [#allocation5], %s328_s0, %s328_s0, %s329_s7  }
  0xfc   :  { %s298_s17 = scalar_lea.vmem %s407_s3, 512  ;;  %p303_p3 = scmp.lt.s32.totalorder %s407_s3, %s407_s3 }
  0xfd   :  { %p299_p2 = scmp.ne.s32.totalorder %s407_s3, %s298_s17  ;;  %p304_p4 = scmp.lt.s32.totalorder %s298_s17, %s298_s17 }
  0xff   :  { %p305_p5 = por %p304_p4, %p303_p3 }
 0x101   :  { %p306_p6 = pnand %p305_p5, %p299_p2 }
 0x103   :  { %309 = shalt.err (!%p306_p6)
}
 0x104   :  { %s310_s20 = scalar_lea.hbm %s475_s6, 512 }
 0x105   :  { %p311_p7 = scmp.ne.s32.totalorder %s475_s6, %s310_s20  ;;  %p314_p8 = scmp.lt.u32.totalorder %s310_s20, %s475_s6 }
 0x107   :  { %p316_p9 = pnand %p314_p8, %p311_p7 }
 0x109   :  { %319 = shalt.err (!%p316_p9)
}
 0x10a   :  { %212 = dma.vmem_to_hbm [thread:$0]  %s407_s3, 512, %s475_s6, [#allocation5], %s328_s0, %s328_s0, %s329_s7  }
 0x10b   :  { %320 = dma.done.wait [#allocation3], 512  }
 0x10c   :  { %321 = vsyncadd [#allocation3], 4294966784 }
 0x10d   :  { %322 = dma.done.wait [#allocation5], 1024  }
 0x10e   :  { %323 = vsyncadd [#allocation5], 4294966272 }
 0x10f   :  { %222 = vsyncpa [#allocation3], 1 }
 0x110   :  { %223 = vsyncpa [#allocation5], 1 }

</bundles_post_ra>
